<compile_context>
chip_gen: v7x
topology: tpu7x:2x2x1
jax: 0.10.0
libtpu: 0.0.40
codegen_flags: <defaults>
</compile_context>

<pallas_src>
import functools

import jax
import jax.numpy as jnp
from jax.experimental import pallas as pl
from jax.experimental.pallas import tpu as pltpu


def _row_tile(n, target=256):
    """Largest destination-row tile <= target that divides n (n % 8 == 0)."""
    t = min(n, target)
    while t > 8 and (n % t != 0 or t % 8 != 0):
        t -= 8
    if n % t != 0:
        t = n
    return t


# ----------------------------------------------------------------------------
# Cumulative LayerNorm chain:  hs[m] = LN^(m+1)(h)   (matches h = LN(h) loop).
# ----------------------------------------------------------------------------
def _ln_chain_kernel(x_ref, g_ref, b_ref, o_ref, *, num_paths):
    x = x_ref[...]
    g = g_ref[...]
    b = b_ref[...]
    for m in range(num_paths):
        mu = jnp.mean(x, axis=-1, keepdims=True)
        var = jnp.mean((x - mu) ** 2, axis=-1, keepdims=True)
        x = (x - mu) * jax.lax.rsqrt(var + 1e-5) * g + b
        o_ref[m] = x


def ln_chain(h, gamma, beta, num_paths):
    n, d = h.shape
    tile = _row_tile(n)
    return pl.pallas_call(
        functools.partial(_ln_chain_kernel, num_paths=num_paths),
        out_shape=jax.ShapeDtypeStruct((num_paths, n, d), jnp.float32),
        grid=(n // tile,),
        in_specs=[pl.BlockSpec((tile, d), lambda t: (t, 0)),
                  pl.BlockSpec((1, d), lambda t: (0, 0)),
                  pl.BlockSpec((1, d), lambda t: (0, 0))],
        out_specs=pl.BlockSpec((num_paths, tile, d), lambda t: (0, t, 0)),
        compiler_params=pltpu.CompilerParams(dimension_semantics=("parallel",)),
    )(h, gamma, beta)


# ----------------------------------------------------------------------------
# Batched GATConv: one call for all metapaths, grid = (M, dst_tiles).
#   z  = LN(h) @ W                       (N, H*F)     (computed once per m)
#   el/er = z @ [AL | AR]                (N, 2H)      (block-diag attn vecs)
#   e[h,i,j] = LeakyReLU(er[i,h]+el[j,h]); masked softmax over sources j
#   out = ELU(alpha @ z_h + bias)        single dense store of (T, H*F)
# ----------------------------------------------------------------------------
def _gat_kernel(hs_ref, w_ref, alr_ref, bias_ref, adj_ref, o_ref,
                z_scr, el_scr, er_scr, *, num_heads, out_feats, tile):
    t = pl.program_id(1)
    H, F = num_heads, out_feats

    @pl.when(t == 0)
    def _():
        x = hs_ref[...].astype(jnp.bfloat16)
        z = jnp.dot(x, w_ref[...], preferred_element_type=jnp.float32)    # (N, HF)
        zb = z.astype(jnp.bfloat16)
        z_scr[...] = zb
        s = jnp.dot(zb, alr_ref[...], preferred_element_type=jnp.float32)  # (N, 2H)
        el_scr[...] = s[:, :H]
        er_scr[...] = s[:, H:]

    adj = adj_ref[...].astype(jnp.float32)                     # (T, N) 0/1 mask
    el = el_scr[...]                                           # (N, H) source scores
    start = pl.multiple_of(t * tile, tile)
    er = er_scr[pl.ds(start, tile), :]                         # (T, H) dst scores

    # Head-batched attention logits: e[h, i, j] = LeakyReLU(er[i,h] + el[j,h])
    e = er.T[:, :, None] + el.T[:, None, :]                    # (H, T, N)
    e = jnp.where(e > 0, e, 0.2 * e)                           # LeakyReLU(0.2)
    adj_b = adj[None]                                          # (1, T, N)
    mmax = jnp.max(jnp.where(adj_b > 0, e, -1e30), axis=-1, keepdims=True)
    p = jnp.exp(jnp.minimum(e - mmax, 0.0)) * adj_b            # masked numerator
    inv = pl.reciprocal(jnp.sum(p, axis=-1, keepdims=True), approx=True)
    alpha = (p * inv).astype(jnp.bfloat16)                     # (H, T, N)

    z = z_scr[...]                                             # (N, HF) bf16
    outs = [jnp.dot(alpha[h], z[:, h * F:(h + 1) * F],
                    preferred_element_type=jnp.float32) for h in range(H)]
    out = jnp.concatenate(outs, axis=-1) + bias_ref[...]       # (T, HF)
    o_ref[...] = jnp.where(out > 0, out, jnp.expm1(jnp.minimum(out, 0.0)))  # ELU


def gat_conv_all(hs, adj_stack, w, alr, bias, num_heads, out_feats):
    m, n, d = hs.shape
    hf = num_heads * out_feats
    tile = _row_tile(n)
    kern = functools.partial(_gat_kernel, num_heads=num_heads,
                             out_feats=out_feats, tile=tile)
    return pl.pallas_call(
        kern,
        out_shape=jax.ShapeDtypeStruct((m, n, hf), jnp.float32),
        grid=(m, n // tile),
        in_specs=[
            pl.BlockSpec((None, n, d), lambda i, t: (i, 0, 0)),
            pl.BlockSpec((None, d, hf), lambda i, t: (i, 0, 0)),
            pl.BlockSpec((None, hf, 2 * num_heads), lambda i, t: (i, 0, 0)),
            pl.BlockSpec((None, 1, hf), lambda i, t: (i, 0, 0)),
            pl.BlockSpec((None, tile, n), lambda i, t: (i, t, 0)),
        ],
        out_specs=pl.BlockSpec((None, tile, hf), lambda i, t: (i, t, 0)),
        scratch_shapes=[pltpu.VMEM((n, hf), jnp.bfloat16),
                        pltpu.VMEM((n, num_heads), jnp.float32),
                        pltpu.VMEM((n, num_heads), jnp.float32)],
        compiler_params=pltpu.CompilerParams(
            dimension_semantics=("parallel", "arbitrary")),
    )(hs, w, alr, bias, adj_stack)


# ----------------------------------------------------------------------------
# Fused post-stack LayerNorm + semantic attention (AttnSum3d) + eval-BatchNorm.
# z is stacked on axis 0 (M, N, HF) so no transpose is needed.
# ----------------------------------------------------------------------------
def _sem_attn_kernel(z_ref, lng_ref, lnb_ref, w1_ref, b1_ref, q_ref,
                     bns_ref, bnb_ref, o_ref, *, num_paths):
    lng, lnb = lng_ref[...], lnb_ref[...]
    w1, b1, q = w1_ref[...], b1_ref[...], q_ref[...]
    zs, scores = [], []
    for m in range(num_paths):
        zm = z_ref[m]                                          # (T, HF)
        mu = jnp.mean(zm, axis=-1, keepdims=True)
        var = jnp.mean((zm - mu) ** 2, axis=-1, keepdims=True)
        zn = (zm - mu) * jax.lax.rsqrt(var + 1e-5) * lng + lnb
        zs.append(zn)
        tproj = jnp.tanh(jnp.dot(zn.astype(jnp.bfloat16), w1,
                                 preferred_element_type=jnp.float32) + b1)
        scores.append(jnp.sum(tproj * q, axis=-1, keepdims=True))   # (T, 1)
    smax = scores[0]
    for m in range(1, num_paths):
        smax = jnp.maximum(smax, scores[m])
    ps = [jnp.exp(s - smax) for s in scores]
    denom = ps[0]
    for m in range(1, num_paths):
        denom = denom + ps[m]
    inv = pl.reciprocal(denom, approx=True)
    out = (ps[0] * inv) * zs[0]
    for m in range(1, num_paths):
        out = out + (ps[m] * inv) * zs[m]
    # folded eval-mode BatchNorm1d (per-channel affine)
    o_ref[...] = out * bns_ref[...] + bnb_ref[...]


def sem_attn_bn(z, lng, lnb, w1, b1, q, bn_scale, bn_shift):
    m, n, d = z.shape
    tile = _row_tile(n)
    full2 = lambda shape: pl.BlockSpec(shape, lambda t: (0, 0))
    return pl.pallas_call(
        functools.partial(_sem_attn_kernel, num_paths=m),
        out_shape=jax.ShapeDtypeStruct((n, d), jnp.float32),
        grid=(n // tile,),
        in_specs=[pl.BlockSpec((m, tile, d), lambda t: (0, t, 0)),
                  full2((1, d)), full2((1, d)),
                  full2(w1.shape), full2((1, d)), full2((1, d)),
                  full2((1, d)), full2((1, d))],
        out_specs=pl.BlockSpec((tile, d), lambda t: (t, 0)),
        compiler_params=pltpu.CompilerParams(dimension_semantics=("parallel",)),
    )(z, lng, lnb, w1, b1, q, bn_scale, bn_shift)


# ----------------------------------------------------------------------------
# MLP head: Linear -> Linear (no activation, matching nn.Sequential).
# ----------------------------------------------------------------------------
def _mlp_kernel(x_ref, w1_ref, b1_ref, w2_ref, b2_ref, o_ref):
    t = jnp.dot(x_ref[...].astype(jnp.bfloat16), w1_ref[...],
                preferred_element_type=jnp.float32) + b1_ref[...]
    o_ref[...] = jnp.dot(t.astype(jnp.bfloat16), w2_ref[...],
                         preferred_element_type=jnp.float32) + b2_ref[...]


def mlp(x, w1, b1, w2, b2):
    n, d = x.shape
    hid = w1.shape[1]
    out_dim = w2.shape[1]
    tile = _row_tile(n)
    return pl.pallas_call(
        _mlp_kernel,
        out_shape=jax.ShapeDtypeStruct((n, out_dim), jnp.float32),
        grid=(n // tile,),
        in_specs=[pl.BlockSpec((tile, d), lambda t: (t, 0)),
                  pl.BlockSpec((d, hid), lambda t: (0, 0)),
                  pl.BlockSpec((1, hid), lambda t: (0, 0)),
                  pl.BlockSpec((hid, out_dim), lambda t: (0, 0)),
                  pl.BlockSpec((1, out_dim), lambda t: (0, 0))],
        out_specs=pl.BlockSpec((tile, out_dim), lambda t: (t, 0)),
        compiler_params=pltpu.CompilerParams(dimension_semantics=("parallel",)),
    )(x, w1, b1, w2, b2)


# ----------------------------------------------------------------------------
# Model wiring.
# ----------------------------------------------------------------------------
def han_forward(adj_stack, h, prepped):
    for lp in prepped["layers"]:
        hs = ln_chain(h, lp["ln_gamma"], lp["ln_beta"], lp["num_paths"])
        z = gat_conv_all(hs, adj_stack, lp["gat_w"], lp["gat_alr"],
                         lp["gat_bias"], lp["num_heads"], lp["out_size"])
        h = sem_attn_bn(z, lp["ln_gamma"], lp["ln_beta"], lp["sem_w1"],
                        lp["sem_b1"], lp["sem_q"], lp["bn_scale"], lp["bn_shift"])
    logits = mlp(h, prepped["mlp_w1"], prepped["mlp_b1"],
                 prepped["mlp_w2"], prepped["mlp_b2"])
    return h, logits


def init_params(key, num_meta_paths, in_size, hidden_size, out_size, num_heads):
    def nrm(k, shape, scale=0.1):
        return scale * jax.random.normal(k, shape, jnp.float32)

    keys = iter(jax.random.split(key, 256))
    layers = []
    layer_in = in_size
    for heads in num_heads:
        hf = hidden_size * heads
        gat = []
        for _ in range(num_meta_paths):
            gat.append({
                "w": nrm(next(keys), (layer_in, hf)),
                "attn_l": nrm(next(keys), (heads, hidden_size)),
                "attn_r": nrm(next(keys), (heads, hidden_size)),
                "bias": nrm(next(keys), (hf,)),
            })
        layers.append({
            "num_heads": heads,
            "out_size": hidden_size,
            "ln_gamma": 1.0 + nrm(next(keys), (layer_in,)),
            "ln_beta": nrm(next(keys), (layer_in,)),
            "gat": gat,
            "sem_w1": nrm(next(keys), (hf, hf)),
            "sem_b1": nrm(next(keys), (hf,)),
            "sem_q": nrm(next(keys), (hf, 1)),
        })
        layer_in = hf

    d_final = hidden_size * num_heads[-1]
    return {
        "layers": layers,
        "bn_gamma": 1.0 + nrm(next(keys), (d_final,)),
        "bn_beta": nrm(next(keys), (d_final,)),
        "bn_rmean": jnp.zeros((d_final,), jnp.float32),
        "bn_rvar": jnp.ones((d_final,), jnp.float32),
        "mlp_w1": nrm(next(keys), (d_final, 2 * num_heads[-1] * hidden_size)),
        "mlp_b1": nrm(next(keys), (2 * num_heads[-1] * hidden_size,)),
        "mlp_w2": nrm(next(keys), (2 * num_heads[-1] * hidden_size, out_size)),
        "mlp_b2": nrm(next(keys), (out_size,)),
    }


def prepare_params(params):
    """One-time parameter prep: stacking, block-diag attn vecs, bf16 weight
    casts, reshapes, and eval-mode BatchNorm folding (hoisted off the forward
    path per performance review)."""
    bn_scale = params["bn_gamma"] * jax.lax.rsqrt(params["bn_rvar"] + 1e-5)
    bn_shift = params["bn_beta"] - params["bn_rmean"] * bn_scale
    layers = []
    for lp in params["layers"]:
        heads, f = lp["num_heads"], lp["out_size"]
        hf = heads * f
        ws, alrs, biases = [], [], []
        for g in lp["gat"]:
            ws.append(g["w"].astype(jnp.bfloat16))
            al = jnp.zeros((hf, heads), jnp.float32)
            ar = jnp.zeros((hf, heads), jnp.float32)
            for h in range(heads):
                al = al.at[h * f:(h + 1) * f, h].set(g["attn_l"][h])
                ar = ar.at[h * f:(h + 1) * f, h].set(g["attn_r"][h])
            alrs.append(jnp.concatenate([al, ar], axis=1).astype(jnp.bfloat16))
            biases.append(g["bias"].reshape(1, hf))
        layers.append({
            "num_paths": len(lp["gat"]),
            "num_heads": heads,
            "out_size": f,
            "ln_gamma": lp["ln_gamma"].reshape(1, -1),
            "ln_beta": lp["ln_beta"].reshape(1, -1),
            "gat_w": jnp.stack(ws, 0),
            "gat_alr": jnp.stack(alrs, 0),
            "gat_bias": jnp.stack(biases, 0),
            "sem_w1": lp["sem_w1"].astype(jnp.bfloat16),
            "sem_b1": lp["sem_b1"].reshape(1, -1),
            "sem_q": lp["sem_q"].reshape(1, -1),
            "bn_scale": bn_scale.reshape(1, -1),
            "bn_shift": bn_shift.reshape(1, -1),
        })
    return {
        "layers": layers,
        "mlp_w1": params["mlp_w1"].astype(jnp.bfloat16),
        "mlp_b1": params["mlp_b1"].reshape(1, -1),
        "mlp_w2": params["mlp_w2"].astype(jnp.bfloat16),
        "mlp_b2": params["mlp_b2"].reshape(1, -1),
    }


def pad_inputs(h, adjs):
    """Pad node count to a multiple of 8 for row tiling; padded rows get a
    self loop so their softmax denominator stays non-zero."""
    n = h.shape[0]
    n_pad = ((n + 7) // 8) * 8
    if n_pad == n:
        return h, list(adjs), n
    pad = n_pad - n
    h_p = jnp.pad(h, ((0, pad), (0, 0)))
    idx = jnp.arange(n, n_pad)
    adjs_p = []
    for a in adjs:
        ap = jnp.pad(a, ((0, pad), (0, pad)))
        ap = ap.at[idx, idx].set(1.0)
        adjs_p.append(ap)
    return h_p, adjs_p, n


if __name__ == "__main__":
    # in_size == hidden_size * num_heads[0] so the shared LayerNorm(in_size)
    # also applies to the stacked head embeddings (as the original forward
    # requires).
    N = 16
    NUM_META_PATHS = 2
    IN_SIZE = 32
    HIDDEN = 8
    NUM_HEADS = [4, 4]
    NUM_CLASSES = 2

    key = jax.random.PRNGKey(0)
    k_h, k_adj, k_par = jax.random.split(key, 3)

    h0 = jax.random.normal(k_h, (N, IN_SIZE), jnp.float32)

    # Dense adjacency masks per metapath, with self-loops (add_self_loop).
    adj_keys = jax.random.split(k_adj, NUM_META_PATHS)
    eye = jnp.eye(N, dtype=jnp.float32)
    adjs = [jnp.maximum((jax.random.uniform(ak, (N, N)) < 0.3).astype(jnp.float32), eye)
            for ak in adj_keys]

    params = init_params(k_par, NUM_META_PATHS, IN_SIZE, HIDDEN, NUM_CLASSES, NUM_HEADS)
    prepped = prepare_params(params)

    h_pad, adjs_pad, n_valid = pad_inputs(h0, adjs)
    adj_stack = jnp.stack(adjs_pad, 0).astype(jnp.bfloat16)   # compact 0/1 mask

    h_out, logits = han_forward(adj_stack, h_pad, prepped)
    h_out, logits = h_out[:n_valid], logits[:n_valid]
    jax.block_until_ready((h_out, logits))

    assert h_out.shape == (N, HIDDEN * NUM_HEADS[-1])
    assert logits.shape == (N, NUM_CLASSES)
    assert bool(jnp.all(jnp.isfinite(h_out))) and bool(jnp.all(jnp.isfinite(logits)))
    print("KERNEL_OK")
</pallas_src>

<mosaic_0001>
module attributes {stable_mosaic.version = 11 : i64} {
  func.func @_ln_chain_kernel(%arg0: i32, %arg1: memref<16x32xf32, #tpu.memory_space<vmem>>, %arg2: memref<1x32xf32, #tpu.memory_space<vmem>>, %arg3: memref<1x32xf32, #tpu.memory_space<vmem>>, %arg4: memref<2x16x32xf32, #tpu.memory_space<vmem>>) attributes {dimension_semantics = [#tpu.dimension_semantics<parallel>], iteration_bounds = array<i64: 1>, scalar_prefetch = 0 : i64, scratch_operands = 0 : i64, tpu.core_type = #tpu.core_type<tc>, window_params = [{transform_indices = @transform_0, window_bounds = array<i64: 16, 32>}, {pipeline_mode = #tpu.pipeline_mode<synchronous>, transform_indices = @transform_1, window_bounds = array<i64: 1, 32>}, {pipeline_mode = #tpu.pipeline_mode<synchronous>, transform_indices = @transform_2, window_bounds = array<i64: 1, 32>}, {transform_indices = @transform_3, window_bounds = array<i64: 2, 16, 32>}]} {
    %c0 = arith.constant 0 : index
    %c0_0 = arith.constant 0 : index
    %0 = vector.load %arg1[%c0, %c0_0] : memref<16x32xf32, #tpu.memory_space<vmem>>, vector<16x32xf32>
    %c0_1 = arith.constant 0 : index
    %c0_2 = arith.constant 0 : index
    %1 = vector.load %arg2[%c0_1, %c0_2] : memref<1x32xf32, #tpu.memory_space<vmem>>, vector<1x32xf32>
    %c0_3 = arith.constant 0 : index
    %c0_4 = arith.constant 0 : index
    %2 = vector.load %arg3[%c0_3, %c0_4] : memref<1x32xf32, #tpu.memory_space<vmem>>, vector<1x32xf32>
    %cst = arith.constant dense<0.000000e+00> : vector<16xf32>
    %3 = vector.multi_reduction <add>, %0, %cst [1] : vector<16x32xf32> to vector<16xf32>
    %4 = vector.shape_cast %3 : vector<16xf32> to vector<16x1xf32>
    %cst_5 = arith.constant 3.200000e+01 : f32
    %5 = vector.broadcast %cst_5 : f32 to vector<16x1xf32>
    %6 = arith.divf %4, %5 : vector<16x1xf32>
    %7 = vector.broadcast %6 : vector<16x1xf32> to vector<16x32xf32>
    %8 = arith.subf %0, %7 : vector<16x32xf32>
    %9 = arith.mulf %8, %8 : vector<16x32xf32>
    %cst_6 = arith.constant dense<0.000000e+00> : vector<16xf32>
    %10 = vector.multi_reduction <add>, %9, %cst_6 [1] : vector<16x32xf32> to vector<16xf32>
    %11 = vector.shape_cast %10 : vector<16xf32> to vector<16x1xf32>
    %cst_7 = arith.constant 3.200000e+01 : f32
    %12 = vector.broadcast %cst_7 : f32 to vector<16x1xf32>
    %13 = arith.divf %11, %12 : vector<16x1xf32>
    %14 = vector.broadcast %6 : vector<16x1xf32> to vector<16x32xf32>
    %15 = arith.subf %0, %14 : vector<16x32xf32>
    %cst_8 = arith.constant 9.99999974E-6 : f32
    %16 = vector.broadcast %cst_8 : f32 to vector<16x1xf32>
    %17 = arith.addf %13, %16 : vector<16x1xf32>
    %18 = math.rsqrt %17 : vector<16x1xf32>
    %19 = vector.broadcast %18 : vector<16x1xf32> to vector<16x32xf32>
    %20 = arith.mulf %15, %19 : vector<16x32xf32>
    %21 = vector.broadcast %1 : vector<1x32xf32> to vector<16x32xf32>
    %22 = arith.mulf %20, %21 : vector<16x32xf32>
    %23 = vector.broadcast %2 : vector<1x32xf32> to vector<16x32xf32>
    %24 = arith.addf %22, %23 : vector<16x32xf32>
    %c0_9 = arith.constant 0 : index
    %c0_10 = arith.constant 0 : index
    %c0_11 = arith.constant 0 : index
    %25 = vector.load %arg4[%c0_9, %c0_10, %c0_11] : memref<2x16x32xf32, #tpu.memory_space<vmem>>, vector<1x16x32xf32>
    %26 = vector.shape_cast %25 : vector<1x16x32xf32> to vector<16x32xf32>
    %27 = vector.shape_cast %24 : vector<16x32xf32> to vector<1x16x32xf32>
    tpu.vector_store %arg4[%c0_9, %c0_10, %c0_11], %27 {strides = array<i32>} : memref<2x16x32xf32, #tpu.memory_space<vmem>>, vector<1x16x32xf32>,
    %cst_12 = arith.constant dense<0.000000e+00> : vector<16xf32>
    %28 = vector.multi_reduction <add>, %24, %cst_12 [1] : vector<16x32xf32> to vector<16xf32>
    %29 = vector.shape_cast %28 : vector<16xf32> to vector<16x1xf32>
    %cst_13 = arith.constant 3.200000e+01 : f32
    %30 = vector.broadcast %cst_13 : f32 to vector<16x1xf32>
    %31 = arith.divf %29, %30 : vector<16x1xf32>
    %32 = vector.broadcast %31 : vector<16x1xf32> to vector<16x32xf32>
    %33 = arith.subf %24, %32 : vector<16x32xf32>
    %34 = arith.mulf %33, %33 : vector<16x32xf32>
    %cst_14 = arith.constant dense<0.000000e+00> : vector<16xf32>
    %35 = vector.multi_reduction <add>, %34, %cst_14 [1] : vector<16x32xf32> to vector<16xf32>
    %36 = vector.shape_cast %35 : vector<16xf32> to vector<16x1xf32>
    %cst_15 = arith.constant 3.200000e+01 : f32
    %37 = vector.broadcast %cst_15 : f32 to vector<16x1xf32>
    %38 = arith.divf %36, %37 : vector<16x1xf32>
    %39 = vector.broadcast %31 : vector<16x1xf32> to vector<16x32xf32>
    %40 = arith.subf %24, %39 : vector<16x32xf32>
    %cst_16 = arith.constant 9.99999974E-6 : f32
    %41 = vector.broadcast %cst_16 : f32 to vector<16x1xf32>
    %42 = arith.addf %38, %41 : vector<16x1xf32>
    %43 = math.rsqrt %42 : vector<16x1xf32>
    %44 = vector.broadcast %43 : vector<16x1xf32> to vector<16x32xf32>
    %45 = arith.mulf %40, %44 : vector<16x32xf32>
    %46 = vector.broadcast %1 : vector<1x32xf32> to vector<16x32xf32>
    %47 = arith.mulf %45, %46 : vector<16x32xf32>
    %48 = vector.broadcast %2 : vector<1x32xf32> to vector<16x32xf32>
    %49 = arith.addf %47, %48 : vector<16x32xf32>
    %c1 = arith.constant 1 : index
    %c0_17 = arith.constant 0 : index
    %c0_18 = arith.constant 0 : index
    %50 = vector.load %arg4[%c1, %c0_17, %c0_18] : memref<2x16x32xf32, #tpu.memory_space<vmem>>, vector<1x16x32xf32>
    %51 = vector.shape_cast %50 : vector<1x16x32xf32> to vector<16x32xf32>
    %52 = vector.shape_cast %49 : vector<16x32xf32> to vector<1x16x32xf32>
    tpu.vector_store %arg4[%c1, %c0_17, %c0_18], %52 {strides = array<i32>} : memref<2x16x32xf32, #tpu.memory_space<vmem>>, vector<1x16x32xf32>,
    return
  }
  func.func @transform_0(%arg0: i32) -> (i32, i32) {
    %c0_i32 = arith.constant 0 : i32
    %c0_i32_0 = arith.constant 0 : i32
    return %arg0, %c0_i32 : i32, i32
  }
  func.func @transform_1(%arg0: i32) -> (i32, i32) {
    %c0_i32 = arith.constant 0 : i32
    %c0_i32_0 = arith.constant 0 : i32
    %c0_i32_1 = arith.constant 0 : i32
    return %c0_i32, %c0_i32_0 : i32, i32
  }
  func.func @transform_2(%arg0: i32) -> (i32, i32) {
    %c0_i32 = arith.constant 0 : i32
    %c0_i32_0 = arith.constant 0 : i32
    %c0_i32_1 = arith.constant 0 : i32
    return %c0_i32, %c0_i32_0 : i32, i32
  }
  func.func @transform_3(%arg0: i32) -> (i32, i32, i32) {
    %c0_i32 = arith.constant 0 : i32
    %c0_i32_0 = arith.constant 0 : i32
    %c0_i32_1 = arith.constant 0 : i32
    return %c0_i32, %arg0, %c0_i32_0 : i32, i32, i32
  }
}

</mosaic_0001>

<bundles_post_ra>
// kernel: tpu_custom_call.1
= control target key start
LH: loop header
LB: loop body
LE: loop exit
PB: predicated region body
PF: predicated region fallthrough
CT: control target
= control target key end

     0   :  { %8 = vsyncpa [#allocation3], 0  ;;  %s263_s0 = inlined_call_operand.hbm [shape: f32[16,32], index: 0, kind: input, shape index: {}]   ;;  %s264_s1 = inlined_call_operand.vmem [shape: f32[1,32], index: 1, kind: input, shape index: {}]   ;;  %s265_s2 = inlined_call_operand.vmem [shape: f32[1,32], index: 2, kind: input, shape index: {}]   ;;  %s266_s3 = inlined_call_operand.hbm [shape: f32[2,16,32], index: 3, kind: output, shape index: {}]  }
   0x1   :  { %9 = vsyncpa [#allocation4], 0  ;;  %s191_s12 = smov [#allocation2]   ;;  %s143_s16 = scalar_lea.hbm %s263_s0, 256 }
   0x2   :  { %s15_s13 = sshll.u32 %s191_s12, 4  ;;  %p144_p0 = scmp.ne.s32.totalorder %s263_s0, %s143_s16  ;;  %s16_s13 = int_to_ptr.vmem [resolvable:$true] %s15_s13 }
   0x3   :  { %p147_p1 = scmp.lt.u32.totalorder %s143_s16, %s263_s0 }
   0x5   :  { %p149_p2 = pnand %p147_p1, %p144_p0 }
   0x7   :  { %152 = shalt.err (!%p149_p2)
}
   0x8   :  { %s153_s21 = scalar_lea.vmem %s16_s13, 256  ;;  %p158_p4 = scmp.lt.s32.totalorder %s16_s13, %s16_s13 }
   0x9   :  { %p154_p3 = scmp.ne.s32.totalorder %s16_s13, %s153_s21  ;;  %p159_p5 = scmp.lt.s32.totalorder %s153_s21, %s153_s21 }
   0xb   :  { %p160_p6 = por %p159_p5, %p158_p4 }
   0xd   :  { %p161_p7 = pnand %p160_p6, %p154_p3 }
   0xf   :  { %164 = shalt.err (!%p161_p7)
}
  0x10   :  { %s192_s22 = smov 128   ;;  %s193_s23 = smov 8  }
  0x11   :  { %21 = dma.hbm_to_vmem [thread:$0]  %s263_s0, 256, %s16_s13, [#allocation3], %s192_s22, %s192_s22, %s193_s23  }
  0x12   :  { %187 = dma.done.wait [#allocation3], 256  }
  0x13   :  { %188 = vsyncadd [#allocation3], 4294967040  ;;  %vm33_vm0 = vcmask 261120   ;;  %v29_v0 = vld [vmem:[#allocation2] sm:$0xff]  ;;  %v30_v1 = vld [vmem:[#allocation2 + $0x8] sm:$0xff] }
  0x14   :  { %v34_v2 = vsel %vm33_vm0, %v29_v0, 0.0  ;;  %v37_v3 = vsel %vm33_vm0, %v30_v1, 0.0  ;;  %v129_v21 = vld [vmem:[%s264_s1] ss:$0 sm:$0xff]  ;;  %s194_s1 = smov [#allocation5]  }
  0x15   :  { %35 = vadd.xlane.f32.xlu0 %v34_v2  ;;  %v130_v23 = vld [vmem:[%s265_s2] ss:$0 sm:$0xff]  ;;  %s117_s2 = sshll.u32 %s194_s1, 4  ;;  %s118_s2 = int_to_ptr.vmem [resolvable:$true] %s117_s2 }
  0x16   :  { %s165_s29 = scalar_lea.vmem %s118_s2, 512  ;;  %p170_p9 = scmp.lt.s32.totalorder %s118_s2, %s118_s2 }
  0x17   :  { %p166_p8 = scmp.ne.s32.totalorder %s118_s2, %s165_s29  ;;  %p171_p10 = scmp.lt.s32.totalorder %s165_s29, %s165_s29 }
  0x19   :  { %38 = vadd.xlane.f32.xlu0 %v37_v3  ;;  %p172_p11 = por %p171_p10, %p170_p9 }
  0x1b   :  { %p173_p12 = pnand %p172_p11, %p166_p8 }
  0xa2   :  { %v36_v4 = vpop.xlane.xlu0 %35 }
  0xa3   :  { %v41_v5 = vmul.f32 0.03125, %v36_v4 }
  0xa5   :  { %v43_v6 = vsub.f32 %v29_v0, %v41_v5 }
  0xa6   :  { %v39_v7 = vpop.xlane.xlu0 %38 }
  0xa7   :  { %v42_v8 = vmul.f32 0.03125, %v39_v7  ;;  %v45_v9 = vmul.f32 %v43_v6, %v43_v6 }
  0xa9   :  { %v44_v10 = vsub.f32 %v30_v1, %v42_v8  ;;  %v47_v11 = vsel %vm33_vm0, %v45_v9, 0.0 }
  0xaa   :  { %48 = vadd.xlane.f32.xlu1 %v47_v11 }
  0xab   :  { %v46_v12 = vmul.f32 %v44_v10, %v44_v10 }
  0xad   :  { %v50_v13 = vsel %vm33_vm0, %v46_v12, 0.0 }
  0xae   :  { %51 = vadd.xlane.f32.xlu1 %v50_v13 }
 0x137   :  { %v49_v14 = vpop.xlane.xlu1 %48 }
 0x138   :  { %v53_v15 = vmul.f32 0.03125, %v49_v14 }
 0x13a   :  { %v55_v16 = vadd.f32 1e-05, %v53_v15 }
 0x13b   :  { %v52_v17 = vpop.xlane.xlu1 %51 }
 0x13c   :  { %135 = vrsqrt.f32 %v55_v16  ;;  %v54_v18 = vmul.f32 0.03125, %v52_v17 }
 0x13e   :  { %v56_v19 = vadd.f32 1e-05, %v54_v18 }
 0x140   :  { %137 = vrsqrt.f32 %v56_v19 }
 0x146   :  { %v136_v20 = vpop.eup %135 }
 0x147   :  { %v59_v22 = vmul.f32 %v136_v20, %v43_v6 }
 0x149   :  { %v67_v24 = vmul.f32 %v129_v21, %v59_v22 }
 0x14a   :  { %v138_v25 = vpop.eup %137 }
 0x14b   :  { %v75_v26 = vadd.f32 %v130_v23, %v67_v24  ;;  %v60_v27 = vmul.f32 %v138_v25, %v44_v10 }
 0x14d   :  { %v79_v28 = vsel %vm33_vm0, %v75_v26, 0.0  ;;  %77 = vst.msk [vmem:[#allocation5] sm:$0xff] %vm33_vm0, %v75_v26  ;;  %v68_v29 = vmul.f32 %v129_v21, %v60_v27 }
 0x14e   :  { %80 = vadd.xlane.f32.xlu0 %v79_v28 }
 0x14f   :  { %v76_v30 = vadd.f32 %v130_v23, %v68_v29 }
 0x151   :  { %v82_v31 = vsel %vm33_vm0, %v76_v30, 0.0  ;;  %78 = vst.msk [vmem:[#allocation5 + $0x8] sm:$0xff] %vm33_vm0, %v76_v30 }
 0x152   :  { %83 = vadd.xlane.f32.xlu1 %v82_v31 }
 0x1db   :  { %v81_v32 = vpop.xlane.xlu0 %80 }
 0x1dc   :  { %v85_v33 = vmul.f32 0.03125, %v81_v32 }
 0x1de   :  { %v87_v34 = vsub.f32 %v75_v26, %v85_v33 }
 0x1df   :  { %v84_v35 = vpop.xlane.xlu1 %83 }
 0x1e0   :  { %v86_v36 = vmul.f32 0.03125, %v84_v35  ;;  %v89_v37 = vmul.f32 %v87_v34, %v87_v34 }
 0x1e2   :  { %v88_v38 = vsub.f32 %v76_v30, %v86_v36  ;;  %v91_v39 = vsel %vm33_vm0, %v89_v37, 0.0 }
 0x1e3   :  { %92 = vadd.xlane.f32.xlu0 %v91_v39 }
 0x1e4   :  { %v90_v40 = vmul.f32 %v88_v38, %v88_v38 }
 0x1e6   :  { %v94_v41 = vsel %vm33_vm0, %v90_v40, 0.0 }
 0x1e7   :  { %95 = vadd.xlane.f32.xlu1 %v94_v41 }
 0x270   :  { %v93_v42 = vpop.xlane.xlu0 %92 }
 0x271   :  { %v97_v43 = vmul.f32 0.03125, %v93_v42 }
 0x273   :  { %v99_v44 = vadd.f32 1e-05, %v97_v43 }
 0x274   :  { %v96_v45 = vpop.xlane.xlu1 %95 }
 0x275   :  { %139 = vrsqrt.f32 %v99_v44  ;;  %v98_v46 = vmul.f32 0.03125, %v96_v45 }
 0x277   :  { %v100_v47 = vadd.f32 1e-05, %v98_v46 }
 0x279   :  { %141 = vrsqrt.f32 %v100_v47 }
 0x27f   :  { %v140_v48 = vpop.eup %139 }
 0x280   :  { %v103_v49 = vmul.f32 %v140_v48, %v87_v34 }
 0x282   :  { %v105_v50 = vmul.f32 %v129_v21, %v103_v49 }
 0x283   :  { %v142_v51 = vpop.eup %141 }
 0x284   :  { %v104_v52 = vmul.f32 %v142_v51, %v88_v38  ;;  %v107_v53 = vadd.f32 %v130_v23, %v105_v50 }
 0x286   :  { %v106_v54 = vmul.f32 %v129_v21, %v104_v52  ;;  %110 = vst.msk [vmem:[#allocation5 + $0x10] sm:$0xff] %vm33_vm0, %v107_v53 }
 0x288   :  { %v108_v55 = vadd.f32 %v130_v23, %v106_v54 }
 0x28a   :  { %111 = vst.msk [vmem:[#allocation5 + $0x18] sm:$0xff] %vm33_vm0, %v108_v55 }
 0x28b   :  { %176 = shalt.err (!%p173_p12)
}
 0x28c   :  { %s177_s5 = scalar_lea.hbm %s266_s3, 512 }
 0x28d   :  { %p178_p13 = scmp.ne.s32.totalorder %s266_s3, %s177_s5  ;;  %p181_p0 = scmp.lt.u32.totalorder %s177_s5, %s266_s3 }
 0x28f   :  { %p183_p1 = pnand %p181_p0, %p178_p13 }
 0x291   :  { %186 = shalt.err (!%p183_p1)
}
 0x292   :  { %123 = dma.vmem_to_hbm [thread:$0]  %s118_s2, 512, %s266_s3, [#allocation4], %s192_s22, %s192_s22, %s193_s23  }
 0x293   :  { %189 = dma.done.wait [#allocation4], 512  }
 0x294   :  { %190 = vsyncadd [#allocation4], 4294966784 }
 0x295   :  { %127 = vsyncpa [#allocation3], 1 }
 0x296   :  { %128 = vsyncpa [#allocation4], 1 }

</bundles_post_ra>
